<compile_context>
chip_gen: v7x
topology: tpu7x:2x2x1
jax: 0.10.0
libtpu: 0.0.40
codegen_flags: <defaults>
</compile_context>

<pallas_src>
import jax
import jax.numpy as jnp
from jax.experimental import pallas as pl
from jax.experimental.pallas import tpu as pltpu


def _round_up(x: int, m: int) -> int:
    return ((x + m - 1) // m) * m


def _vmem_budget():
    """(physical VMEM bytes, safe vmem_limit_bytes) with a conservative fallback."""
    phys = 64 * (1 << 20)
    try:
        phys = int(pltpu.get_tpu_info().vmem_capacity_bytes)
    except Exception:
        pass
    if phys >= 100 * (1 << 20):          # v5e / v6e class (128 MiB)
        return phys, 96 * (1 << 20)
    return phys, 56 * (1 << 20)          # v7x (64 MiB / TC) or unknown


_M_LADDER = (512, 256, 128, 64, 32, 16, 8)
_LANE_LADDER = (1024, 512, 256, 128)


def _pick_tile(dim: int, ladder, cap: int) -> int:
    """Pick a tile from `ladder` (descending) that nearly minimizes padding,
    preferring larger tiles among near-minimal-padding candidates."""
    cands = [t for t in ladder if t <= cap] or [min(ladder)]
    padded = [(t, _round_up(dim, t)) for t in cands]
    best = min(p for _, p in padded)
    thresh = max(best, int(best * 1.0625))
    return max(t for t, p in padded if p <= thresh)


# ---------------------------------------------------------------------------
# Kernels
# ---------------------------------------------------------------------------
def _linear_resident_kernel(x_ref, w_ref, b_ref, o_ref):
    # x_ref: (tm, kp) activations; w_ref: (kp, np) resident W^T;
    # b_ref: (1, np) f32 bias; o_ref: (tm, np).
    acc = jnp.dot(x_ref[...], w_ref[...], preferred_element_type=jnp.float32)
    o_ref[...] = (acc + b_ref[...]).astype(o_ref.dtype)


def _linear_tiled_kernel(x_ref, w_ref, b_ref, o_ref, acc_ref):
    # x_ref: (tm, tk); w_ref: (tk, tn) pre-transposed W^T; b_ref: (1, tn) f32;
    # o_ref: (tm, tn); acc_ref: (tm, tn) f32, resident across the K grid axis.
    kk = pl.program_id(2)

    @pl.when(kk == 0)
    def _():
        # Fold bias into the accumulator init -> epilogue is just cast+store.
        acc_ref[...] = jnp.zeros(acc_ref.shape, jnp.float32) + b_ref[...]

    acc_ref[...] += jnp.dot(x_ref[...], w_ref[...],
                            preferred_element_type=jnp.float32)

    @pl.when(kk == pl.num_programs(2) - 1)
    def _():
        o_ref[...] = acc_ref[...].astype(o_ref.dtype)


# ---------------------------------------------------------------------------
# Wrapper: one-time parameter prep + jitted forward
# ---------------------------------------------------------------------------
def make_linear(weight, bias, *, compute_dtype=None):
    """weight: (out_features, in_features) [PyTorch layout], bias: (out_features,).

    Returns a jitted forward(x) computing x @ weight.T + bias for x of shape
    (..., in_features)."""
    weight = jnp.asarray(weight)
    bias = jnp.asarray(bias)
    n, k = weight.shape

    cdt = jnp.dtype(compute_dtype) if compute_dtype is not None else jnp.dtype(weight.dtype)
    sublane = 16 if cdt == jnp.dtype(jnp.bfloat16) else 8
    itemsize = cdt.itemsize

    phys_vmem, vmem_limit = _vmem_budget()
    if phys_vmem >= 100 * (1 << 20):        # v5e / v6e: plenty of VMEM
        tm_cap, tn_cap, tk_cap = 512, 1024, 1024
    else:                                   # v7x (64 MiB/TC) or unknown
        tm_cap, tn_cap, tk_cap = 512, 512, 512

    # Fast path: whole weight comfortably resident in VMEM, single K block.
    small = (k <= 512) and (n <= 512)

    if small:
        kp = _round_up(k, 128)
        np_ = _round_up(n, 128)
    else:
        tn = _pick_tile(n, _LANE_LADDER, tn_cap)
        tk = _pick_tile(k, _LANE_LADDER, tk_cap)
        np_ = _round_up(n, tn)
        kp = _round_up(k, tk)

    # One-time parameter prep: transpose to (in, out) + zero-pad (padded K rows
    # contribute nothing; padded N columns are sliced off after the call).
    w_t = jnp.pad(weight.astype(cdt).T, ((0, kp - k), (0, np_ - n)))
    b_p = jnp.pad(bias.astype(jnp.float32), (0, np_ - n)).reshape(1, np_)

    m_ladder = tuple(t for t in _M_LADDER if t % sublane == 0) or (sublane,)

    def forward(x):
        out_dtype = x.dtype
        lead = x.shape[:-1]
        x2 = x.reshape(-1, k).astype(cdt)
        m = x2.shape[0]

        tm = _pick_tile(_round_up(m, sublane), m_ladder, tm_cap)
        mp = _round_up(m, tm)
        x_p = jnp.pad(x2, ((0, mp - m), (0, kp - k)))

        if small:
            cost = pl.CostEstimate(
                flops=2 * mp * np_ * kp, transcendentals=0,
                bytes_accessed=(mp * kp + kp * np_ + mp * np_ + np_) * itemsize)
            out_p = pl.pallas_call(
                _linear_resident_kernel,
                out_shape=jax.ShapeDtypeStruct((mp, np_), out_dtype),
                grid_spec=pltpu.PrefetchScalarGridSpec(
                    num_scalar_prefetch=0,
                    grid=(mp // tm,),
                    in_specs=[
                        pl.BlockSpec((tm, kp), lambda i: (i, 0)),   # x tile
                        pl.BlockSpec((kp, np_), lambda i: (0, 0)),  # resident W^T
                        pl.BlockSpec((1, np_), lambda i: (0, 0)),   # resident bias
                    ],
                    out_specs=pl.BlockSpec((tm, np_), lambda i: (i, 0)),
                ),
                compiler_params=pltpu.CompilerParams(
                    dimension_semantics=("parallel",),
                    vmem_limit_bytes=vmem_limit,
                ),
                cost_estimate=cost,
            )(x_p, w_t, b_p)
        else:
            gm, gn, gk = mp // tm, np_ // tn, kp // tk
            cost = pl.CostEstimate(
                flops=2 * mp * np_ * kp, transcendentals=0,
                bytes_accessed=(mp * kp * gn + np_ * kp * gm + mp * np_ + np_) * itemsize)
            out_p = pl.pallas_call(
                _linear_tiled_kernel,
                out_shape=jax.ShapeDtypeStruct((mp, np_), out_dtype),
                grid_spec=pltpu.PrefetchScalarGridSpec(
                    num_scalar_prefetch=0,
                    grid=(gm, gn, gk),
                    in_specs=[
                        pl.BlockSpec((tm, tk), lambda i, j, kk: (i, kk)),  # x
                        pl.BlockSpec((tk, tn), lambda i, j, kk: (kk, j)),  # W^T
                        pl.BlockSpec((1, tn), lambda i, j, kk: (0, j)),    # bias
                    ],
                    out_specs=pl.BlockSpec((tm, tn), lambda i, j, kk: (i, j)),
                    scratch_shapes=[pltpu.VMEM((tm, tn), jnp.float32)],
                ),
                compiler_params=pltpu.CompilerParams(
                    dimension_semantics=("parallel", "parallel", "arbitrary"),
                    vmem_limit_bytes=vmem_limit,
                ),
                cost_estimate=cost,
            )(x_p, w_t, b_p)

        return out_p[:m, :n].reshape(*lead, n)

    return jax.jit(forward)


if __name__ == "__main__":
    input_size = 1
    output_size = 1
    batch = 8

    key = jax.random.PRNGKey(0)
    kx, kw, kb, kx2, kw2, kb2 = jax.random.split(key, 6)

    # Deterministic synthetic parameters (PyTorch-default-like uniform init).
    bound = 1.0 / (input_size ** 0.5)
    weight = jax.random.uniform(kw, (output_size, input_size),
                                minval=-bound, maxval=bound, dtype=jnp.float32)
    bias = jax.random.uniform(kb, (output_size,),
                              minval=-bound, maxval=bound, dtype=jnp.float32)
    x = jax.random.normal(kx, (batch, input_size), dtype=jnp.float32)

    linear = make_linear(weight, bias)
    y = linear(x)
    jax.block_until_ready(y)

    y_ref = x @ weight.T + bias
    assert y.shape == (batch, output_size)
    assert jnp.allclose(y, y_ref, atol=1e-5, rtol=1e-5)

    # Secondary check: exercises the general tiled-GEMM path (K > 512).
    m2, k2, n2 = 256, 1024, 512
    w2 = jax.random.normal(kw2, (n2, k2), dtype=jnp.float32) * 0.05
    b2 = jax.random.normal(kb2, (n2,), dtype=jnp.float32) * 0.05
    x2 = jax.random.normal(kx2, (m2, k2), dtype=jnp.float32)
    linear2 = make_linear(w2, b2)
    y2 = linear2(x2)
    jax.block_until_ready(y2)
    y2_ref = x2 @ w2.T + b2
    assert jnp.allclose(y2, y2_ref, atol=1e-3, rtol=1e-3)

    # TODO(synk): a pure-VPU broadcast-mul + lane-reduce kernel could shave a
    # bit more off the degenerate in=out=1 case; the resident-weight MXU fast
    # path is kept for generality across small layers.

    print("KERNEL_OK")
</pallas_src>

<mosaic_0001>
module attributes {stable_mosaic.version = 11 : i64} {
  func.func @_linear_resident_kernel(%arg0: i32, %arg1: memref<8x128xf32, #tpu.memory_space<vmem>>, %arg2: memref<128x128xf32, #tpu.memory_space<vmem>>, %arg3: memref<1x128xf32, #tpu.memory_space<vmem>>, %arg4: memref<8x128xf32, #tpu.memory_space<vmem>>) attributes {dimension_semantics = [#tpu.dimension_semantics<parallel>], iteration_bounds = array<i64: 1>, scalar_prefetch = 0 : i64, scratch_operands = 0 : i64, tpu.core_type = #tpu.core_type<tc>, window_params = [{transform_indices = @transform_0, window_bounds = array<i64: 8, 128>}, {pipeline_mode = #tpu.pipeline_mode<synchronous>, transform_indices = @transform_1, window_bounds = array<i64: 128, 128>}, {pipeline_mode = #tpu.pipeline_mode<synchronous>, transform_indices = @transform_2, window_bounds = array<i64: 1, 128>}, {transform_indices = @transform_3, window_bounds = array<i64: 8, 128>}]} {
    %c0 = arith.constant 0 : index
    %c0_0 = arith.constant 0 : index
    %0 = vector.load %arg1[%c0, %c0_0] : memref<8x128xf32, #tpu.memory_space<vmem>>, vector<8x128xf32>
    %c0_1 = arith.constant 0 : index
    %c0_2 = arith.constant 0 : index
    %1 = vector.load %arg2[%c0_1, %c0_2] : memref<128x128xf32, #tpu.memory_space<vmem>>, vector<128x128xf32>
    %cst = arith.constant dense<0.000000e+00> : vector<8x128xf32>
    %2 = tpu.matmul %0, %1, %cst {dimension_numbers = #tpu.dot_dimension_numbers<[1], [0], [0], [1], [0, 0, 1, 1], [], []>} : vector<8x128xf32>, vector<128x128xf32>, vector<8x128xf32> -> vector<8x128xf32>
    %c0_3 = arith.constant 0 : index
    %c0_4 = arith.constant 0 : index
    %3 = vector.load %arg3[%c0_3, %c0_4] : memref<1x128xf32, #tpu.memory_space<vmem>>, vector<1x128xf32>
    %4 = vector.broadcast %3 : vector<1x128xf32> to vector<8x128xf32>
    %5 = arith.addf %2, %4 : vector<8x128xf32>
    %c0_5 = arith.constant 0 : index
    %c0_6 = arith.constant 0 : index
    %6 = vector.load %arg4[%c0_5, %c0_6] : memref<8x128xf32, #tpu.memory_space<vmem>>, vector<8x128xf32>
    tpu.vector_store %arg4[%c0_5, %c0_6], %5 {strides = array<i32>} : memref<8x128xf32, #tpu.memory_space<vmem>>, vector<8x128xf32>,
    return
  }
  func.func @transform_0(%arg0: i32) -> (i32, i32) {
    %c0_i32 = arith.constant 0 : i32
    %c0_i32_0 = arith.constant 0 : i32
    return %arg0, %c0_i32 : i32, i32
  }
  func.func @transform_1(%arg0: i32) -> (i32, i32) {
    %c0_i32 = arith.constant 0 : i32
    %c0_i32_0 = arith.constant 0 : i32
    %c0_i32_1 = arith.constant 0 : i32
    return %c0_i32, %c0_i32_0 : i32, i32
  }
  func.func @transform_2(%arg0: i32) -> (i32, i32) {
    %c0_i32 = arith.constant 0 : i32
    %c0_i32_0 = arith.constant 0 : i32
    %c0_i32_1 = arith.constant 0 : i32
    return %c0_i32, %c0_i32_0 : i32, i32
  }
  func.func @transform_3(%arg0: i32) -> (i32, i32) {
    %c0_i32 = arith.constant 0 : i32
    %c0_i32_0 = arith.constant 0 : i32
    return %arg0, %c0_i32 : i32, i32
  }
}

</mosaic_0001>

<bundles_post_ra>
// kernel: forward.1
= control target key start
LH: loop header
LB: loop body
LE: loop exit
PB: predicated region body
PF: predicated region fallthrough
CT: control target
= control target key end

     0   :  { %8 = vsyncpa [#allocation3], 0  ;;  %s235_s12 = smov [#allocation2]   ;;  %s282_s0 = inlined_call_operand.vmem [shape: f32[8,128], index: 0, kind: input, shape index: {}]   ;;  %s283_s1 = inlined_call_operand.hbm [shape: f32[128,128], index: 1, kind: input, shape index: {}]   ;;  %s284_s2 = inlined_call_operand.vmem [shape: f32[1,128], index: 2, kind: input, shape index: {}]   ;;  %s285_s3 = inlined_call_operand.vmem [shape: f32[8,128], index: 3, kind: output, shape index: {}]  }
   0x1   :  { %s16_s13 = sshll.u32 %s235_s12, 4  ;;  %s211_s16 = scalar_lea.hbm %s283_s1, 2048  ;;  %s17_s13 = int_to_ptr.vmem [resolvable:$true] %s16_s13 }
   0x2   :  { %p212_p0 = scmp.ne.s32.totalorder %s283_s1, %s211_s16  ;;  %p215_p1 = scmp.lt.u32.totalorder %s211_s16, %s283_s1 }
   0x4   :  { %p217_p2 = pnand %p215_p1, %p212_p0 }
   0x6   :  { %220 = shalt.err (!%p217_p2)
}
   0x7   :  { %s221_s21 = scalar_lea.vmem %s17_s13, 2048  ;;  %p226_p4 = scmp.lt.s32.totalorder %s17_s13, %s17_s13 }
   0x8   :  { %p222_p3 = scmp.ne.s32.totalorder %s17_s13, %s221_s21  ;;  %p227_p5 = scmp.lt.s32.totalorder %s221_s21, %s221_s21 }
   0xa   :  { %p228_p6 = por %p227_p5, %p226_p4 }
   0xc   :  { %p229_p7 = pnand %p228_p6, %p222_p3 }
   0xe   :  { %232 = shalt.err (!%p229_p7)
}
   0xf   :  { %s236_s22 = smov 128   ;;  %s237_s23 = smov 8  }
  0x10   :  { %22 = dma.hbm_to_vmem [thread:$0]  %s283_s1, 2048, %s17_s13, [#allocation3], %s236_s22, %s236_s22, %s237_s23  }
  0x11   :  { %233 = dma.done.wait [#allocation3], 2048  }
  0x12   :  { %234 = vsyncadd [#allocation3], 4294965248  ;;  %v238_v0 = vmov 0.0|0.0   ;;  %vm239_vm0 = vmmov 0   ;;  %v240_v1 = vmov 0.0   ;;  %v29_v2 = vld [vmem:[#allocation2] sm:$0xff] }
  0x13   :  { %181 = vmatprep.subr.bf16.mxu0 %v238_v0  ;;  %178 = vmatprep.mubr.msk.f32.mxu0 %vm239_vm0, %v240_v1  ;;  %v30_v3 = vld [vmem:[#allocation2 + $0x8] sm:$0xff]  ;;  %v31_v4 = vld [vmem:[#allocation2 + $0x10] sm:$0xff]  ;;  %v32_v6 = vld [vmem:[#allocation2 + $0x18] sm:$0xff] }
  0x14   :  { %v182_v5 = vpack.c.bf16 %v30_v3, %v29_v2  ;;  %v185_v7 = vpack.c.bf16 %v32_v6, %v31_v4  ;;  %v33_v8 = vld [vmem:[#allocation2 + $0x20] sm:$0xff]  ;;  %v34_v9 = vld [vmem:[#allocation2 + $0x28] sm:$0xff]  ;;  %v35_v11 = vld [vmem:[#allocation2 + $0x30] sm:$0xff] }
  0x15   :  { %v188_v10 = vpack.c.bf16 %v34_v9, %v33_v8  ;;  %v36_v12 = vld [vmem:[#allocation2 + $0x38] sm:$0xff]  ;;  %v37_v14 = vld [vmem:[#allocation2 + $0x40] sm:$0xff]  ;;  %v38_v15 = vld [vmem:[#allocation2 + $0x48] sm:$0xff] }
  0x16   :  { %183 = vmatpush3.bf16.msra.mxu0 %v182_v5  ;;  %v191_v13 = vpack.c.bf16 %v36_v12, %v35_v11  ;;  %v194_v16 = vpack.c.bf16 %v38_v15, %v37_v14  ;;  %v39_v17 = vld [vmem:[#allocation2 + $0x50] sm:$0xff]  ;;  %v40_v18 = vld [vmem:[#allocation2 + $0x58] sm:$0xff]  ;;  %v41_v20 = vld [vmem:[#allocation2 + $0x60] sm:$0xff] }
  0x17   :  { %184 = vmatprep.subr.bf16.mxu0 %v238_v0  ;;  %v197_v19 = vpack.c.bf16 %v40_v18, %v39_v17  ;;  %v42_v21 = vld [vmem:[#allocation2 + $0x68] sm:$0xff]  ;;  %v43_v23 = vld [vmem:[#allocation2 + $0x70] sm:$0xff]  ;;  %v44_v24 = vld [vmem:[#allocation2 + $0x78] sm:$0xff] }
  0x18   :  { %v200_v22 = vpack.c.bf16 %v42_v21, %v41_v20  ;;  %v203_v25 = vpack.c.bf16 %v44_v24, %v43_v23  ;;  %v28_v26 = vld [vmem:[%s282_s0] sm:$0xff] }
  0x19   :  { %v128_v27 = vld [vmem:[%s284_s2] ss:$0 sm:$0xff] }
  0x1a   :  { %186 = vmatpush3.bf16.msra.mxu0 %v185_v7 }
  0x1b   :  { %187 = vmatprep.subr.bf16.mxu0 %v238_v0 }
  0x1e   :  { %189 = vmatpush3.bf16.msra.mxu0 %v188_v10 }
  0x1f   :  { %190 = vmatprep.subr.bf16.mxu0 %v238_v0 }
  0x22   :  { %192 = vmatpush3.bf16.msra.mxu0 %v191_v13 }
  0x23   :  { %193 = vmatprep.subr.bf16.mxu0 %v238_v0 }
  0x26   :  { %195 = vmatpush3.bf16.msra.mxu0 %v194_v16 }
  0x27   :  { %196 = vmatprep.subr.bf16.mxu0 %v238_v0 }
  0x2a   :  { %198 = vmatpush3.bf16.msra.mxu0 %v197_v19 }
  0x2b   :  { %199 = vmatprep.subr.bf16.mxu0 %v238_v0 }
  0x2e   :  { %201 = vmatpush3.bf16.msra.mxu0 %v200_v22 }
  0x2f   :  { %202 = vmatprep.subr.bf16.mxu0 %v238_v0 }
  0x32   :  { %204 = vmatpush3.bf16.msra.mxu0 %v203_v25 }
  0x35   :  { %179 = vmatmul.mubr.f32.vlgmr.msra.gmra.mrb[0].mxu0 %v28_v26 }
 0x108   :  { %v118_v28 = vpop.f32.mrb[0].mxu0 }
 0x109   :  { %v119_v29 = vadd.f32 %v128_v27, %v118_v28  ;;  %v180_v30 = vpop.f32.mrb[1].mxu0 }
 0x10b   :  { %122 = vst [vmem:[%s285_s3] sm:$0xff] %v119_v29 }
 0x10c   :  { %127 = vsyncpa [#allocation3], 1 }

</bundles_post_ra>
